<compile_context>
chip_gen: v7x
topology: tpu7x:2x2x1
jax: 0.10.0
libtpu: 0.0.40
codegen_flags: <defaults>
</compile_context>

<pallas_src>
import functools

import jax
import jax.numpy as jnp
from jax.experimental import pallas as pl
from jax.experimental.pallas import tpu as pltpu


def _attentive_pool_kernel(x_ref, len_ref, wa_ref, ba_ref, w_ref, out_ref, *, t_valid):
    # x_ref  : (TB, Tp, Hp) activations, native dtype (bf16 or f32)
    # len_ref: (TB, 1)      int32 valid lengths
    # wa_ref : (Hp, Hp)     W_a weight, pre-transposed to (in, out), activation dtype
    # ba_ref : (1, Hp)      W_a bias, activation dtype
    # w_ref  : (1, Hp)      W weight row (== W^T), activation dtype
    # out_ref: (TB, Hp)     pooled utterance representations (f32)
    TB, T, H = x_ref.shape
    x = x_ref[...]

    # h = ReLU(x @ W_a^T + b_a): one (TB*T, Hp) @ (Hp, Hp) MXU matmul (bf16 MXU pipe when
    # the operands are bf16), f32 accumulation. T % 8 == 0 and H % 128 == 0 so the
    # collapse below is a free view.
    x2 = x.reshape(TB * T, H)
    h = jnp.dot(x2, wa_ref[...], preferred_element_type=jnp.float32)
    h = jnp.maximum(h + ba_ref[...].astype(jnp.float32), 0.0)            # (TB*T, Hp) f32

    # logits on a lane-dense (TB, T) layout: VPU multiply + XLU lane reduction over H.
    # (The N=1 projection never occupies the MXU.)
    w = w_ref[...].astype(jnp.float32).reshape(1, 1, H)
    logits = jnp.sum(h.reshape(TB, T, H) * w, axis=-1)                   # (TB, T) f32

    # Additive 0/1 length mask rebuilt in-kernel (faithful to s3prl: padded-but-real frames
    # keep exp(-1) down-weighting, they are NOT excluded). Alignment-pad frames introduced
    # by the wrapper (t >= t_valid) are fully excluded so T padding cannot change results.
    t_idx = jax.lax.broadcasted_iota(jnp.int32, (TB, T), 1)
    logits = logits + (t_idx < len_ref[...]).astype(jnp.float32)
    if t_valid < T:
        logits = jnp.where(t_idx < t_valid, logits, -1e30)

    # Softmax over T on the lane axis.
    m = jnp.max(logits, axis=-1, keepdims=True)                          # (TB, 1)
    e = jnp.exp(logits - m)
    att = e / jnp.sum(e, axis=-1, keepdims=True)                         # (TB, T) f32

    # Weighted sum over T: multiply in the native activation dtype, accumulate in f32.
    att_x = att.astype(x.dtype)
    pooled = jnp.sum(x * att_x[:, :, None], axis=1, dtype=jnp.float32)   # (TB, Hp) f32
    out_ref[...] = pooled.astype(out_ref.dtype)


def _round_up(n, m):
    return ((n + m - 1) // m) * m


def _vmem_budget_bytes():
    """~75% of physical per-core VMEM (~48 MiB on v7x, ~96 MiB on v5e/v6e)."""
    phys = 64 * 1024 * 1024                      # conservative fallback (v7x-sized)
    try:
        phys = int(pltpu.get_tpu_info().vmem_capacity_bytes)
    except Exception:
        pass
    return (phys * 3) // 4


def _pick_block_b(batch, seq_len, hidden, x_bytes, vmem_budget, target_rows=512):
    """Pick TB (batch rows per grid step).

    Candidates are multiples of 8 dividing B (the pooled-output block keeps TB on the
    sublane axis). Preference order: fits the VMEM budget > grid >= 2 (feeds both v7x
    TensorCores) > TB*T >= target_rows MXU rows (amortizes the ~0.35us per-step overhead
    and the 256-wide MXU on v6e/v7x).
    """
    def vmem_use(tb):
        x_tile = 2 * tb * seq_len * hidden * x_bytes            # double-buffered x DMA
        h_f32 = tb * seq_len * hidden * 4                       # ReLU activations (f32)
        weights = 2 * (hidden * hidden + 2 * hidden) * x_bytes  # W_a / b_a / w buffers
        small = 6 * tb * seq_len * 4 + 2 * tb * hidden * 4 + 2 * tb * 8
        return x_tile + h_f32 + weights + small

    cands = [tb for tb in range(8, batch + 1, 8) if batch % tb == 0]
    if not cands:
        cands = [batch]                                          # tiny/odd batch: 1 step
    fitting = [tb for tb in cands if vmem_use(tb) <= vmem_budget]
    if not fitting:
        fitting = [cands[0]]
    multi = [tb for tb in fitting if batch // tb >= 2]
    pool = multi if multi else fitting
    for tb in pool:
        if tb * seq_len >= target_rows:
            return tb
    return pool[-1]


def attentive_pooling(feature_BxTxH, features_len, wa_T, ba, w_row, bw=None, *,
                      block_b=None, target_rows=512):
    """Pallas forward of s3prl AttentivePooling.

    Args:
      feature_BxTxH: (B, T, H) activations (f32 or bf16).
      features_len : (B,)      int lengths.
      wa_T         : (H, H)    W_a weight transposed to (in, out).
      ba           : (H,)      W_a bias.
      w_row        : (1, H)    W weight (the torch (1, H) weight as a row).
      bw           : ()        W bias (accepted for API parity; a per-row constant cancels
                               exactly in the softmax, so it is not used).

    Returns:
      (sap_vec (B, H) float32, ones (B,) int32)   -- matching AttentivePooling.forward
    """
    del bw  # mathematically a no-op under the softmax
    B, T, H = feature_BxTxH.shape
    dt = feature_BxTxH.dtype
    x_bytes = jnp.dtype(dt).itemsize

    # Lane/sublane alignment: Hp % 128 == 0 (lane-dense vregs, full MXU columns, unmasked
    # output stores), Tp % 8 == 0 (free reshape in-kernel).
    Hp = _round_up(H, 128)
    Tp = _round_up(T, 8)

    x_p = jnp.pad(feature_BxTxH, ((0, 0), (0, Tp - T), (0, Hp - H)))
    wa_p = jnp.pad(jnp.asarray(wa_T, dt), ((0, Hp - H), (0, Hp - H)))
    ba_p = jnp.pad(jnp.asarray(ba, dt).reshape(1, H), ((0, 0), (0, Hp - H)))
    w_p = jnp.pad(jnp.asarray(w_row, dt).reshape(1, H), ((0, 0), (0, Hp - H)))
    lens = features_len.astype(jnp.int32).reshape(B, 1)

    budget = _vmem_budget_bytes()
    if block_b is None:
        # Leave ~15% of the budget as headroom for compiler scratch / pipelining slack.
        block_b = _pick_block_b(B, Tp, Hp, x_bytes, (budget * 85) // 100, target_rows)
    assert B % block_b == 0, (B, block_b)
    grid = (B // block_b,)

    kernel = functools.partial(_attentive_pool_kernel, t_valid=T)

    grid_spec = pltpu.PrefetchScalarGridSpec(
        num_scalar_prefetch=0,
        grid=grid,
        in_specs=[
            pl.BlockSpec((block_b, Tp, Hp), lambda b: (b, 0, 0)),   # x (native dtype)
            pl.BlockSpec((block_b, 1), lambda b: (b, 0)),           # lengths (int32)
            pl.BlockSpec((Hp, Hp), lambda b: (0, 0)),               # W_a^T (resident)
            pl.BlockSpec((1, Hp), lambda b: (0, 0)),                # b_a   (resident)
            pl.BlockSpec((1, Hp), lambda b: (0, 0)),                # w row (resident)
        ],
        out_specs=pl.BlockSpec((block_b, Hp), lambda b: (b, 0)),    # lane-dense output
    )

    pooled = pl.pallas_call(
        kernel,
        out_shape=jax.ShapeDtypeStruct((B, Hp), jnp.float32),
        grid_spec=grid_spec,
        compiler_params=pltpu.CompilerParams(
            dimension_semantics=("parallel",),     # batch axis shards across TCs (v7x)
            vmem_limit_bytes=int(budget)),
    )(x_p, lens, wa_p, ba_p, w_p)

    if Hp != H:
        pooled = pooled[:, :H]

    # TODO(synk): for very long utterances on v7x (TB*Tp*Hp pushing the 64 MiB budget),
    # add an inner T-chunk reduction axis with an online softmax (running max / denom /
    # weighted-sum VMEM scratch, finalized via pl.when on the last chunk).

    # torch.ones(len(x)).long(); emitted as int32 (JAX x64 is disabled by default).
    return pooled, jnp.ones((B,), dtype=jnp.int32)


def _reference(x, features_len, wa_T, ba, w_row, bw):
    """Pure-JAX reference mirroring the PyTorch forward (including the no-op b_W)."""
    B, T, H = x.shape
    mask = (jnp.arange(T)[None, :] < features_len[:, None]).astype(jnp.float32)
    h = jnp.maximum(x @ wa_T + ba[None, None, :], 0.0)
    logits = jnp.einsum("bth,h->bt", h, w_row.reshape(-1)) + bw + mask
    att = jax.nn.softmax(logits, axis=-1)[..., None]
    return jnp.sum(x * att, axis=1)


if __name__ == "__main__":
    B, T, H = 16, 8, 32
    key = jax.random.PRNGKey(0)
    k_x, k_len, k_wa, k_ba, k_w, k_bw = jax.random.split(key, 6)

    x = jax.random.normal(k_x, (B, T, H), dtype=jnp.float32)
    features_len = jax.random.randint(k_len, (B,), 1, T + 1).astype(jnp.int32)

    # Deterministic params; shapes match nn.Linear(H, H) and nn.Linear(H, 1).
    bound = 1.0 / jnp.sqrt(H)
    wa_T = jax.random.uniform(k_wa, (H, H), minval=-bound, maxval=bound, dtype=jnp.float32)
    ba = jax.random.uniform(k_ba, (H,), minval=-bound, maxval=bound, dtype=jnp.float32)
    w_row = jax.random.uniform(k_w, (1, H), minval=-bound, maxval=bound, dtype=jnp.float32)
    bw = jax.random.uniform(k_bw, (), minval=-bound, maxval=bound, dtype=jnp.float32)

    sap_vec, ones_out = attentive_pooling(x, features_len, wa_T, ba, w_row, bw)
    jax.block_until_ready(sap_vec)

    ref_vec = _reference(x, features_len, wa_T, ba, w_row, bw)
    assert sap_vec.shape == (B, H)
    assert ones_out.shape == (B,) and ones_out.dtype == jnp.int32
    assert jnp.allclose(sap_vec, ref_vec, atol=1e-5, rtol=1e-5), (
        "pooled mismatch, max abs err = "
        + str(float(jnp.max(jnp.abs(sap_vec - ref_vec)))))

    print("KERNEL_OK")
</pallas_src>

<mosaic_0001>
module attributes {stable_mosaic.version = 11 : i64} {
  func.func @_attentive_pool_kernel(%arg0: i32, %arg1: memref<8x8x128xf32, #tpu.memory_space<vmem>>, %arg2: memref<8x1xi32, #tpu.memory_space<vmem>>, %arg3: memref<128x128xf32, #tpu.memory_space<vmem>>, %arg4: memref<1x128xf32, #tpu.memory_space<vmem>>, %arg5: memref<1x128xf32, #tpu.memory_space<vmem>>, %arg6: memref<8x128xf32, #tpu.memory_space<vmem>>) attributes {dimension_semantics = [#tpu.dimension_semantics<parallel>], iteration_bounds = array<i64: 2>, scalar_prefetch = 0 : i64, scratch_operands = 0 : i64, tpu.core_type = #tpu.core_type<tc>, window_params = [{transform_indices = @transform_0, window_bounds = array<i64: 8, 8, 128>}, {transform_indices = @transform_1, window_bounds = array<i64: 8, 1>}, {pipeline_mode = #tpu.pipeline_mode<synchronous>, transform_indices = @transform_2, window_bounds = array<i64: 128, 128>}, {pipeline_mode = #tpu.pipeline_mode<synchronous>, transform_indices = @transform_3, window_bounds = array<i64: 1, 128>}, {pipeline_mode = #tpu.pipeline_mode<synchronous>, transform_indices = @transform_4, window_bounds = array<i64: 1, 128>}, {transform_indices = @transform_5, window_bounds = array<i64: 8, 128>}]} {
    %c0 = arith.constant 0 : index
    %c0_0 = arith.constant 0 : index
    %c0_1 = arith.constant 0 : index
    %0 = vector.load %arg1[%c0, %c0_0, %c0_1] : memref<8x8x128xf32, #tpu.memory_space<vmem>>, vector<8x8x128xf32>
    %1 = vector.shape_cast %0 : vector<8x8x128xf32> to vector<64x128xf32>
    %c0_2 = arith.constant 0 : index
    %c0_3 = arith.constant 0 : index
    %2 = vector.load %arg3[%c0_2, %c0_3] : memref<128x128xf32, #tpu.memory_space<vmem>>, vector<128x128xf32>
    %cst = arith.constant dense<0.000000e+00> : vector<64x128xf32>
    %3 = tpu.matmul %1, %2, %cst {dimension_numbers = #tpu.dot_dimension_numbers<[1], [0], [0], [1], [0, 0, 1, 1], [], []>} : vector<64x128xf32>, vector<128x128xf32>, vector<64x128xf32> -> vector<64x128xf32>
    %c0_4 = arith.constant 0 : index
    %c0_5 = arith.constant 0 : index
    %4 = vector.load %arg4[%c0_4, %c0_5] : memref<1x128xf32, #tpu.memory_space<vmem>>, vector<1x128xf32>
    %5 = vector.broadcast %4 : vector<1x128xf32> to vector<64x128xf32>
    %6 = arith.addf %3, %5 : vector<64x128xf32>
    %cst_6 = arith.constant 0.000000e+00 : f32
    %7 = vector.broadcast %cst_6 : f32 to vector<64x128xf32>
    %8 = arith.maximumf %6, %7 : vector<64x128xf32>
    %c0_7 = arith.constant 0 : index
    %c0_8 = arith.constant 0 : index
    %9 = vector.load %arg5[%c0_7, %c0_8] : memref<1x128xf32, #tpu.memory_space<vmem>>, vector<1x128xf32>
    %10 = vector.shape_cast %9 : vector<1x128xf32> to vector<1x1x128xf32>
    %11 = vector.shape_cast %8 : vector<64x128xf32> to vector<8x8x128xf32>
    %12 = vector.broadcast %10 : vector<1x1x128xf32> to vector<8x8x128xf32>
    %13 = arith.mulf %11, %12 : vector<8x8x128xf32>
    %cst_9 = arith.constant dense<0.000000e+00> : vector<8x8xf32>
    %14 = vector.multi_reduction <add>, %13, %cst_9 [2] : vector<8x8x128xf32> to vector<8x8xf32>
    %15 = tpu.iota {dimensions = array<i32: 1>} : vector<8x8xi32>
    %c0_10 = arith.constant 0 : index
    %c0_11 = arith.constant 0 : index
    %16 = vector.load %arg2[%c0_10, %c0_11] : memref<8x1xi32, #tpu.memory_space<vmem>>, vector<8x1xi32>
    %17 = vector.broadcast %16 : vector<8x1xi32> to vector<8x8xi32>
    %18 = arith.cmpi slt, %15, %17 : vector<8x8xi32>
    %19 = arith.extui %18 : vector<8x8xi1> to vector<8x8xi32>
    %20 = arith.sitofp %19 : vector<8x8xi32> to vector<8x8xf32>
    %21 = arith.addf %14, %20 : vector<8x8xf32>
    %cst_12 = arith.constant dense<0xFF800000> : vector<8xf32>
    %22 = vector.multi_reduction <maximumf>, %21, %cst_12 [1] : vector<8x8xf32> to vector<8xf32>
    %23 = vector.shape_cast %22 : vector<8xf32> to vector<8x1xf32>
    %24 = vector.broadcast %23 : vector<8x1xf32> to vector<8x8xf32>
    %25 = arith.subf %21, %24 : vector<8x8xf32>
    %26 = math.exp %25 : vector<8x8xf32>
    %cst_13 = arith.constant dense<0.000000e+00> : vector<8xf32>
    %27 = vector.multi_reduction <add>, %26, %cst_13 [1] : vector<8x8xf32> to vector<8xf32>
    %28 = vector.shape_cast %27 : vector<8xf32> to vector<8x1xf32>
    %29 = vector.broadcast %28 : vector<8x1xf32> to vector<8x8xf32>
    %30 = arith.divf %26, %29 : vector<8x8xf32>
    %31 = vector.shape_cast %30 : vector<8x8xf32> to vector<8x8x1xf32>
    %32 = vector.broadcast %31 : vector<8x8x1xf32> to vector<8x8x128xf32>
    %33 = arith.mulf %0, %32 : vector<8x8x128xf32>
    %cst_14 = arith.constant dense<0.000000e+00> : vector<8x128xf32>
    %34 = vector.multi_reduction <add>, %33, %cst_14 [1] : vector<8x8x128xf32> to vector<8x128xf32>
    %c0_15 = arith.constant 0 : index
    %c0_16 = arith.constant 0 : index
    %35 = vector.load %arg6[%c0_15, %c0_16] : memref<8x128xf32, #tpu.memory_space<vmem>>, vector<8x128xf32>
    tpu.vector_store %arg6[%c0_15, %c0_16], %34 {strides = array<i32>} : memref<8x128xf32, #tpu.memory_space<vmem>>, vector<8x128xf32>,
    return
  }
  func.func @transform_0(%arg0: i32) -> (i32, i32, i32) {
    %c0_i32 = arith.constant 0 : i32
    %c0_i32_0 = arith.constant 0 : i32
    %c0_i32_1 = arith.constant 0 : i32
    return %arg0, %c0_i32, %c0_i32_0 : i32, i32, i32
  }
  func.func @transform_1(%arg0: i32) -> (i32, i32) {
    %c0_i32 = arith.constant 0 : i32
    %c0_i32_0 = arith.constant 0 : i32
    return %arg0, %c0_i32 : i32, i32
  }
  func.func @transform_2(%arg0: i32) -> (i32, i32) {
    %c0_i32 = arith.constant 0 : i32
    %c0_i32_0 = arith.constant 0 : i32
    %c0_i32_1 = arith.constant 0 : i32
    return %c0_i32, %c0_i32_0 : i32, i32
  }
  func.func @transform_3(%arg0: i32) -> (i32, i32) {
    %c0_i32 = arith.constant 0 : i32
    %c0_i32_0 = arith.constant 0 : i32
    %c0_i32_1 = arith.constant 0 : i32
    return %c0_i32, %c0_i32_0 : i32, i32
  }
  func.func @transform_4(%arg0: i32) -> (i32, i32) {
    %c0_i32 = arith.constant 0 : i32
    %c0_i32_0 = arith.constant 0 : i32
    %c0_i32_1 = arith.constant 0 : i32
    return %c0_i32, %c0_i32_0 : i32, i32
  }
  func.func @transform_5(%arg0: i32) -> (i32, i32) {
    %c0_i32 = arith.constant 0 : i32
    %c0_i32_0 = arith.constant 0 : i32
    return %arg0, %c0_i32 : i32, i32
  }
}

</mosaic_0001>

<bundles_post_ra>
// kernel: tpu_custom_call.1
= control target key start
LH: loop header
LB: loop body
LE: loop exit
PB: predicated region body
PF: predicated region fallthrough
CT: control target
= control target key end

     0   :  { %10 = vsyncpa [#allocation3], 0  ;;  %s1833_s0 = inlined_call_operand.hbm [shape: f32[16,8,128], index: 0, kind: input, shape index: {}]   ;;  %s1834_s1 = inlined_call_operand.vmem [shape: s32[16,1], index: 1, kind: input, shape index: {}]   ;;  %s1835_s2 = inlined_call_operand.hbm [shape: f32[128,128], index: 2, kind: input, shape index: {}]   ;;  %s1836_s3 = inlined_call_operand.vmem [shape: f32[1,128], index: 3, kind: input, shape index: {}]   ;;  %s1837_s4 = inlined_call_operand.vmem [shape: f32[1,128], index: 4, kind: input, shape index: {}]   ;;  %s1838_s5 = inlined_call_operand.hbm [shape: f32[16,128], index: 5, kind: output, shape index: {}]  }
   0x1   :  { %12 = vsyncpa [#allocation3 + $0x1], 0 }
   0x2   :  { %13 = vsyncpa [#allocation6], 0 }
   0x3   :  { %14 = vsyncpa [#allocation4], 0 }
   0x4   :  { %16 = vsyncpa [#allocation4 + $0x1], 0  ;;  %s1430_s18 = smov 0   ;;  %s1432_s19 = smov 0  }
   0x5   :  { %s1434_s20 = smov 0   ;;  %s1436_s21 = smov 0  }
   0x6 LB: > { %s1451_s22 = sadd.s32 4294967295, %s1391_s21   ;;  %s1032_s23 = sadd.s32 4294967294, %s1391_s21   ;;  %s1391_s21 = sphi %s1436_s21, %s1858_s21   ;;  %s1387_s20 = sphi %s1434_s20, %s1857_s20   ;;  %s1383_s19 = sphi %s1432_s19, %s1856_s19   ;;  %s1379_s18 = sphi %s1430_s18, %s1855_s18  }
   0x7   : > { %p42_p0 = scmp.ne.s32.totalorder %s1383_s19, %s1379_s18  ;;  %p1839_p1 = scmp.eq.s32.totalorder %s1451_s22, 0 }
   0x8   : > { %p161_p3 = scmp.eq.s32.totalorder %s1032_s23, 1  ;;  %p1033_p5 = scmp.ge.s32.totalorder %s1391_s21, 1 }
   0x9   : > { %p1460_p4 = por %p1839_p1, %p42_p0  ;;  %p168_p7 = scmp.lt.s32.totalorder %s1391_s21, 3 }
   0xa   : > { %p1465_p6 = por %p161_p3, %p42_p0  ;;  %s1393_s27 = smov [#allocation5]  }
   0xb   : > { %s1842_s24 = scalar_select %p1460_p4, 1, 0 }
   0xc   : > { %s1843_s25 = scalar_select %p1465_p6, 1, 0 }
   0xd   : > { %p1470_p8 = pnand %p1033_p5, %p168_p7  ;;  %s180_s28 = sshll.u32 %s1393_s27, 4  ;;  %s1474_s28 = int_to_ptr.vmem [resolvable:$true] %s180_s28 }
   0xe   : > { %s1486_s30 = sadd.s32 1, %s1391_s21   ;;  %s29_s6 = sadd.s32 1, %s1387_s20 }
   0xf   : > { %s1844_s26 = scalar_select %p1470_p8, 1, 0 }
  0x10   : > { %p1176_p9 = pneg %p1470_p8  ;;  %s26_s7 = ssub.s32 %s1391_s21, %s1486_s30 }
  0x11   : > { %s1263_s10 = scalar_lea.hbm %s1835_s2, 2048 }
  0x12   : > { %p1481_p11 = pnand %p1176_p9, %p1839_p1  ;;  %p1264_p12 = scmp.ne.s32.totalorder %s1835_s2, %s1263_s10 }
  0x13   : > { %p1270_p5 = scmp.lt.u32.totalorder %s1263_s10, %s1835_s2 }
  0x14   : > { %p1265_p13 = pneg %p1481_p11 }
  0x16   : > { %p1266_p0 = pnand %p1265_p13, %p1264_p12 }
  0x18   : > { %p1267_p3 = pneg %p1266_p0 }
  0x1a   : > { %p1272_p7 = pnand %p1270_p5, %p1267_p3 }
  0x1c   : > { %1275 = shalt.err (!%p1272_p7)
}
  0x1d   : > { %s1276_s15 = scalar_lea.vmem %s1474_s28, 2048  ;;  %p1284_p2 = scmp.lt.s32.totalorder %s1474_s28, %s1474_s28 }
  0x1e   : > { %p1277_p9 = scmp.ne.s32.totalorder %s1474_s28, %s1276_s15  ;;  %p1285_p6 = scmp.lt.s32.totalorder %s1276_s15, %s1276_s15 }
  0x20   : > { %p1279_p10 = pnand %p1277_p9, %p1265_p13  ;;  %p1286_p4 = por %p1285_p6, %p1284_p2 }
  0x22   : > { %p1280_p1 = pneg %p1279_p10 }
  0x24   : > { %p1287_p8 = pnand %p1286_p4, %p1280_p1 }
  0x26   : > { %1290 = shalt.err (!%p1287_p8)
}
  0x27   : > { %s1394_s16 = smov 128   ;;  %s1395_s17 = smov 8  }
  0x28   : > { %1179 = dma.hbm_to_vmem [thread:$0]  (!%p1481_p11), %s1835_s2, 2048, %s1474_s28, [#allocation6], %s1394_s16, %s1394_s16, %s1395_s17  }
  0x29   : > { %p27_p1 = scmp.eq.s32.totalorder %s26_s7, 0  ;;  %p36_p2 = scmp.ne.s32.totalorder %s1387_s20, %s1383_s19 }
  0x2a   : > { %p37_p4 = scmp.eq.s32.totalorder %s1391_s21, 0  ;;  %p1189_p6 = scmp.lt.s32.totalorder %s1391_s21, 2 }
  0x2b   : > { %s1520_s8 = scalar_select %p27_p1, %s1387_s20, %s29_s6  }
  0x2c   : > { %p38_p8 = por %p37_p4, %p36_p2  ;;  %p1846_p10 = scmp.eq.s32.totalorder %s1451_s22, 1 }
  0x2d   : > { %s200_s29 = sand.u32 1, %s1387_s20   ;;  %s1051_s10 = sshll.u32 %s1391_s21, 10 }
  0x2e   : > { %p1524_p12 = por %p1846_p10, %p36_p2  ;;  %s1036_s11 = sshll.u32 %s200_s29, 6 }
  0x2f   : > { %s1533_s14 = scalar_lea.hbm %s1833_s0, %s1051_s10  ;;  %s204_s28 = scalar_lea.vmem [#allocation2], %s1036_s11 }
  0x30   : > { %s211_s6 = sshll.u32 %s204_s28, 4  ;;  %p1535_p11 = pnand %p1189_p6, %p38_p8  ;;  %s1539_s6 = int_to_ptr.vmem [resolvable:$true] %s211_s6 }
  0x31   : > { %s1541_s15 = scalar_lea.sflag [#allocation3], %s200_s29  ;;  %s1291_s23 = scalar_lea.hbm %s1533_s14, 1024 }
  0x32   : > { %p1292_p13 = scmp.ne.s32.totalorder %s1533_s14, %s1291_s23  ;;  %p1293_p0 = pneg %p1535_p11 }
  0x33   : > { %s1296_s11 = scalar_lea.hbm %s1833_s0, 2048  ;;  %p1297_p7 = scmp.lt.u32.totalorder %s1533_s14, %s1833_s0 }
  0x34   : > { %p1294_p3 = pnand %p1293_p0, %p1292_p13  ;;  %p1298_p9 = scmp.lt.u32.totalorder %s1296_s11, %s1291_s23 }
  0x35   : > { %p1300_p2 = scmp.lt.u32.totalorder %s1291_s23, %s1533_s14 }
  0x36   : > { %p1295_p5 = pneg %p1294_p3  ;;  %p1299_p1 = por %p1298_p9, %p1297_p7 }
  0x38   : > { %p1301_p4 = por %p1300_p2, %p1299_p1 }
  0x3a   : > { %p1302_p6 = pnand %p1301_p4, %p1295_p5 }
  0x3c   : > { %1305 = shalt.err (!%p1302_p6)
}
  0x3d   : > { %s1306_s29 = scalar_lea.vmem %s1539_s6, 1024  ;;  %s1396_s28 = smov [#allocation2]  }
  0x3e   : > { %p1307_p8 = scmp.ne.s32.totalorder %s1539_s6, %s1306_s29  ;;  %s1311_s27 = sshll.u32 %s1396_s28, 4  ;;  %s1312_s27 = int_to_ptr.vmem [resolvable:$false] %s1311_s27 }
  0x3f   : > { %s1313_s10 = scalar_lea.vmem %s1312_s27, 2048  ;;  %p1314_p3 = scmp.lt.s32.totalorder %s1539_s6, %s1312_s27 }
  0x40   : > { %p1309_p10 = pnand %p1307_p8, %p1293_p0  ;;  %p1315_p7 = scmp.lt.s32.totalorder %s1313_s10, %s1306_s29 }
  0x42   : > { %p1310_p13 = pneg %p1309_p10  ;;  %p1316_p9 = por %p1315_p7, %p1314_p3 }
  0x44   : > { %p1317_p1 = pnand %p1316_p9, %p1310_p13 }
  0x46   : > { %1320 = shalt.err (!%p1317_p1)
}
  0x47   : > { %1183 = dma.hbm_to_vmem [thread:$0]  (!%p1535_p11), %s1533_s14, 1024, %s1539_s6, %s1541_s15, %s1394_s16, %s1394_s16, %s1395_s17  }
  0x48   : > { %p1849_p0 = scmp.ne.s32.totalorder %s1844_s26, 0 }
  0x49   : > { %s1575_s23 = sand.u32 (!%p1849_p0), 1, %s1383_s19   ;;  %p1850_p5 = scmp.ne.s32.totalorder (!%p1849_p0), %s1842_s24, 0 }
  0x4a   : > { %230 = sbr.rel (%p1849_p0) target bundleno = 1301 (0x515), region = 40  ;;  %s1040_s11 = sshll.u32 (!%p1849_p0), %s1575_s23, 6 }
  0x4b   : > { %s233_s12 = scalar_lea.sflag (!%p1849_p0), [#allocation3], %s1575_s23  ;;  %s1579_s13 = scalar_lea.vmem (!%p1849_p0), [#allocation2], %s1040_s11 }
  0x51   : > { %1366 = dma.done.wait (%p1850_p5), %s233_s12, 1024  }
  0x52   : > { %1368 = vsyncadd (%p1850_p5), %s233_s12, 4294966272  ;;  %p1851_p11 = scmp.eq.s32.totalorder %s1451_s22, 0 }
  0x54   : > { %1370 = dma.done.wait (%p1851_p11), [#allocation6], 2048   ;;  %p1852_p2 = pmov %p1851_p11 }
  0x55   : > { %v1397_v0 = vmov 0   ;;  %p272_p4 = scmp.lt.s32.totalorder %s1451_s22, 1  ;;  %v284_v1 = vld [vmem:[#allocation5] sm:$0xff]  ;;  %v285_v2 = vld [vmem:[#allocation5 + $0x8] sm:$0xff]  ;;  %v286_v3 = vld [vmem:[#allocation5 + $0x10] sm:$0xff]  ;;  %v451_v34 = vlaneseq  ;;  %v1398_v42 = vmov 0.0  }
  0x56   : > { %1372 = vsyncadd (%p1852_p2), [#allocation6], 4294965248  ;;  %1229 = vset.pattern.permute.xlu0 %v1397_v0  ;;  %1230 = vset.pattern.permute.xlu1 %v1397_v0  ;;  %v1120_v4 = vpack.c.bf16 %v285_v2, %v284_v1  ;;  %v287_v5 = vld [vmem:[#allocation5 + $0x18] sm:$0xff]  ;;  %v288_v7 = vld [vmem:[#allocation5 + $0x20] sm:$0xff]  ;;  %vm597_vm1 = vcmask 1041409   ;;  %vm599_vm2 = vcmask 1042434  }
  0x57   : > { %s273_s26 = scalar_select %p272_p4, %s1451_s22, 1  ;;  %v1124_v6 = vpack.c.bf16 %v287_v5, %v286_v3  ;;  %v289_v8 = vld [vmem:[#allocation5 + $0x28] sm:$0xff]  ;;  %v1592_v10 = vld [vmem:[%s1579_s13] sm:$0xff]  ;;  %v290_v11 = vld [vmem:[#allocation5 + $0x30] sm:$0xff]  ;;  %v1626_v35 = vshrl.u32 %v451_v34, 7  ;;  %v1628_v36 = vand.u32 127, %v451_v34 }
  0x58   : > { %1121 = vmatprep.subr.bf16.mxu0 %v1120_v4  ;;  %1152 = vmatprep.subr.bf16.mxu1 %v1120_v4  ;;  %v1128_v9 = vpack.c.bf16 %v289_v8, %v288_v7  ;;  %v291_v12 = vld [vmem:[#allocation5 + $0x38] sm:$0xff]  ;;  %v1599_v13 = vld [vmem:[%s1579_s13 + $0x20] sm:$0xff]  ;;  %v293_v17 = vld [vmem:[#allocation5 + $0x48] sm:$0xff]  ;;  %vm601_vm3 = vcmask 1043459   ;;  %vm603_vm4 = vcmask 1044484   ;;  %vm605_vm5 = vcmask 1045509  }
  0x59   : > { %s1043_s24 = sshll.u32 %s273_s26, 3  ;;  %1123 = vmatpush3.bf16.msra.mxu0 %v1120_v4  ;;  %1160 = vmatpush3.bf16.msra.mxu1 %v1120_v4  ;;  %v1132_v15 = vpack.c.bf16 %v291_v12, %v290_v11  ;;  %v292_v16 = vld [vmem:[#allocation5 + $0x40] sm:$0xff]  ;;  %v294_v19 = vld [vmem:[#allocation5 + $0x50] sm:$0xff]  ;;  %v295_v20 = vld [vmem:[#allocation5 + $0x58] sm:$0xff]  ;;  %v1631_v37 = vsub.s32 0, %v1626_v35  ;;  %v1634_v38 = vsub.s32 1, %v1626_v35 }
  0x5a   : > { %1125 = vmatprep.subr.bf16.mxu0 %v1124_v6  ;;  %1153 = vmatprep.subr.bf16.mxu1 %v1124_v6  ;;  %s275_s14 = scalar_lea.vmem %s1834_s1, %s1043_s24  ;;  %v1136_v18 = vpack.c.bf16 %v293_v17, %v292_v16  ;;  %v1140_v21 = vpack.c.bf16 %v295_v20, %v294_v19  ;;  %v296_v22 = vld [vmem:[#allocation5 + $0x60] sm:$0xff]  ;;  %v297_v23 = vld [vmem:[#allocation5 + $0x68] sm:$0xff]  ;;  %v298_v25 = vld [vmem:[#allocation5 + $0x70] sm:$0xff]  ;;  %v1638_v40 = vsub.s32 2, %v1626_v35  ;;  %v1641_v41 = vsub.s32 5, %v1626_v35  ;;  %s1042_s28 = sshll.u32 %s1575_s23, 3 }
  0x5b   : > { %1108 = vmatprep.mubr.f32.mxu0 %v1592_v10  ;;  %1114 = vmatprep.mubr.f32.mxu1 %v1599_v13  ;;  %v453_v14 = vld [vmem:[%s275_s14] sm:$0xff]  ;;  %v1144_v24 = vpack.c.bf16 %v297_v23, %v296_v22  ;;  %v299_v26 = vld [vmem:[#allocation5 + $0x78] sm:$0xff]  ;;  %v1603_v28 = vld [vmem:[%s1579_s13 + $0x8] sm:$0xff]  ;;  %v1647_v47 = vsub.s32 3, %v1626_v35  ;;  %v1652_v50 = vsub.s32 4, %v1626_v35  ;;  %vm607_vm6 = vcmask 1046534  }
  0x5c   : > { %455 = vperm.xlu0 %1229, %v453_v14   ;;  %v1148_v27 = vpack.c.bf16 %v299_v26, %v298_v25  ;;  %v1606_v29 = vld [vmem:[%s1579_s13 + $0x28] sm:$0xff]  ;;  %v1609_v30 = vld [vmem:[%s1579_s13 + $0x10] sm:$0xff]  ;;  %v1618_v32 = vld [vmem:[%s1579_s13 + $0x18] sm:$0xff]  ;;  %v1666_v26 = vsub.s32 6, %v1626_v35  ;;  %vm609_vm7 = vcmask 1047559   ;;  %vm612_vm8 = vcmask 64512  }
  0x5d   : > { %1127 = vmatpush3.bf16.msra.mxu0 %v1124_v6  ;;  %1161 = vmatpush3.bf16.msra.mxu1 %v1124_v6  ;;  %v1612_v31 = vld [vmem:[%s1579_s13 + $0x30] sm:$0xff]  ;;  %v1622_v33 = vld [vmem:[%s1579_s13 + $0x38] sm:$0xff]  ;;  %v1044_v52 = vld [vmem:[%s1836_s3] ss:$0 sm:$0xff]  ;;  %s1048_s27 = sshll.u32 %s1451_s22, 7  ;;  %s270_s10 = scalar_lea.vmem [#allocation7], %s1042_s28 }
  0x5e   : > { %1129 = vmatprep.subr.bf16.mxu0 %v1128_v9  ;;  %1154 = vmatprep.subr.bf16.mxu1 %v1128_v9  ;;  %v1045_v60 = vld [vmem:[%s1837_s4] ss:$0 sm:$0xff]  ;;  %s940_s11 = sshll.u32 %s270_s10, 4  ;;  %s1788_s26 = scalar_lea.hbm %s1838_s5, %s1048_s27  ;;  %s1790_s11 = int_to_ptr.vmem [resolvable:$true] %s940_s11 }
  0x5f   : > { %s927_s22 = scalar_lea.sflag [#allocation4], %s1575_s23  ;;  %s1321_s24 = scalar_lea.vmem %s1790_s11, 128 }
  0x60   : > { %p1322_p6 = scmp.ne.s32.totalorder %s1790_s11, %s1321_s24  ;;  %s1399_s16 = smov [#allocation7]  }
  0x61   : > { %1131 = vmatpush3.bf16.msra.mxu0 %v1128_v9  ;;  %1162 = vmatpush3.bf16.msra.mxu1 %v1128_v9  ;;  %s1325_s17 = sshll.u32 %s1399_s16, 4  ;;  %s1326_s17 = int_to_ptr.vmem [resolvable:$false] %s1325_s17 }
  0x62   : > { %1133 = vmatprep.subr.bf16.mxu0 %v1132_v15  ;;  %1155 = vmatprep.subr.bf16.mxu1 %v1132_v15  ;;  %p1323_p8 = pnand %p1322_p6, %p1524_p12  ;;  %s1327_s14 = scalar_lea.vmem %s1326_s17, 256 }
  0x63   : > { %p1328_p13 = scmp.lt.s32.totalorder %s1790_s11, %s1326_s17  ;;  %p1329_p3 = scmp.lt.s32.totalorder %s1327_s14, %s1321_s24 }
  0x64   : > { %p1324_p10 = pneg %p1323_p8 }
  0x65   : > { %1135 = vmatpush3.bf16.msra.mxu0 %v1132_v15  ;;  %1163 = vmatpush3.bf16.msra.mxu1 %v1132_v15  ;;  %p1330_p7 = por %p1329_p3, %p1328_p13 }
  0x66   : > { %1137 = vmatprep.subr.bf16.mxu0 %v1136_v18  ;;  %1156 = vmatprep.subr.bf16.mxu1 %v1136_v18 }
  0x67   : > { %p1331_p9 = pnand %p1330_p7, %p1324_p10 }
  0x69   : > { %1139 = vmatpush3.bf16.msra.mxu0 %v1136_v18  ;;  %1164 = vmatpush3.bf16.msra.mxu1 %v1136_v18 }
  0x6a   : > { %1141 = vmatprep.subr.bf16.mxu0 %v1140_v21  ;;  %1157 = vmatprep.subr.bf16.mxu1 %v1140_v21 }
  0x6d   : > { %1143 = vmatpush3.bf16.msra.mxu0 %v1140_v21  ;;  %1165 = vmatpush3.bf16.msra.mxu1 %v1140_v21  ;;  %v1662_v21 = vsub.s32 7, %v1626_v35 }
  0x6e   : > { %1145 = vmatprep.subr.bf16.mxu0 %v1144_v24  ;;  %1158 = vmatprep.subr.bf16.mxu1 %v1144_v24 }
  0x71   : > { %1147 = vmatpush3.bf16.msra.mxu0 %v1144_v24  ;;  %1166 = vmatpush3.bf16.msra.mxu1 %v1144_v24 }
  0x72   : > { %1149 = vmatprep.subr.bf16.mxu0 %v1148_v27  ;;  %1159 = vmatprep.subr.bf16.mxu1 %v1148_v27 }
  0x75   : > { %1151 = vmatpush3.bf16.msra.mxu0 %v1148_v27  ;;  %1167 = vmatpush3.bf16.msra.mxu1 %v1148_v27 }
  0x78   : > { %1109 = vmatmul.mubr.f32.vlgmr.msra.gmra.mrb[0].mxu0 %v1603_v28  ;;  %1115 = vmatmul.mubr.f32.vlgmr.msra.gmra.mrb[0].mxu1 %v1606_v29 }
  0x79   : > { %1111 = vmatprep.mubr.f32.mxu0 %v1609_v30  ;;  %1117 = vmatprep.mubr.f32.mxu1 %v1612_v31 }
  0x7c   : > { %1112 = vmatmul.mubr.f32.gmra.mrb[2].mxu0 %v1618_v32  ;;  %1118 = vmatmul.mubr.f32.gmra.mrb[2].mxu1 %v1622_v33 }
  0xdb   : > { %v456_v39 = vpop.permute.xlu0 %455 }
  0xdc   : > { %vm457_vm0 = vcmp.lt.s32.totalorder %v1628_v36, %v456_v39 }
  0xdd   : > { %v1046_v43 = vsel %vm457_vm0, 1.0, %v1398_v42 }
  0xde   : > { %v464_v44 = vrot.slane %v1046_v43, %v1631_v37  ;;  %v471_v45 = vrot.slane %v1046_v43, %v1634_v38  ;;  %v478_v46 = vrot.slane %v1046_v43, %v1638_v40  ;;  %v499_v48 = vrot.slane %v1046_v43, %v1641_v41 }
  0xdf   : > { %v485_v49 = vrot.slane %v1046_v43, %v1647_v47  ;;  %v492_v51 = vrot.slane %v1046_v43, %v1652_v50  ;;  %v513_v24 = vrot.slane %v1046_v43, %v1662_v21  ;;  %v506_v27 = vrot.slane %v1046_v43, %v1666_v26 }
  0xe0   : > { %466 = vbcast.lane.b32.xlu1 %v464_v44, 256  ;;  %473 = vbcast.lane.b32.xlu0 %v471_v45, 256 }
  0xe4   : > { %480 = vbcast.lane.b32.xlu1 %v478_v46, 256  ;;  %501 = vbcast.lane.b32.xlu0 %v499_v48, 256 }
  0xe8   : > { %487 = vbcast.lane.b32.xlu1 %v485_v49, 256 }
  0xec   : > { %494 = vbcast.lane.b32.xlu1 %v492_v51, 256 }
 0x14b   : > { %v1110_v53 = vpop.f32.mrb[0].mxu0  ;;  %v1116_v54 = vpop.f32.mrb[0].mxu1 }
 0x14c   : > { %v379_v55 = vadd.f32 %v1110_v53, %v1044_v52  ;;  %v373_v56 = vpop.f32.mrb[1].mxu0  ;;  %v399_v57 = vadd.f32 %v1116_v54, %v1044_v52  ;;  %v393_v58 = vpop.f32.mrb[1].mxu1 }
 0x14d   : > { %v374_v59 = vadd.f32 %v1044_v52, %v373_v56  ;;  %v394_v2 = vadd.f32 %v1044_v52, %v393_v58 }
 0x14e   : > { %v413_v61 = vmax.f32 %v379_v55, 0.0  ;;  %v417_v62 = vmax.f32 %v399_v57, 0.0 }
 0x14f   : > { %v412_v63 = vmax.f32 %v374_v59, 0.0  ;;  %v1113_v0 = vpop.f32.mrb[2].mxu0  ;;  %v1119_v1 = vpop.f32.mrb[2].mxu1  ;;  %v416_v9 = vmax.f32 %v394_v2, 0.0 }
 0x150   : > { %v428_v3 = vmul.f32 %v1045_v60, %v413_v61  ;;  %v383_v4 = vpop.f32.mrb[3].mxu0  ;;  %v403_v5 = vpop.f32.mrb[3].mxu1  ;;  %v432_v7 = vmul.f32 %v1045_v60, %v417_v62  ;;  %v389_v8 = vadd.f32 %v1113_v0, %v1044_v52  ;;  %v409_v12 = vadd.f32 %v1119_v1, %v1044_v52 }
 0x151   : > { %v427_v6 = vmul.f32 %v1045_v60, %v412_v63  ;;  %v431_v14 = vmul.f32 %v1045_v60, %v416_v9  ;;  %v384_v17 = vadd.f32 %v1044_v52, %v383_v4  ;;  %v404_v20 = vadd.f32 %v1044_v52, %v403_v5 }
 0x152   : > { %437 = vadd.xlane.f32.xlu1 %v428_v3  ;;  %v415_v11 = vmax.f32 %v389_v8, 0.0  ;;  %v419_v15 = vmax.f32 %v409_v12, 0.0  ;;  %v467_v34 = vpop.permute.xlu1 %466  ;;  %v474_v44 = vpop.permute.xlu0 %473  ;;  %v1686_v4 = vsub.s32 %v1628_v36, %v1626_v35 }
 0x153   : > { %435 = vadd.xlane.f32.xlu0 %v427_v6  ;;  %v414_v19 = vmax.f32 %v384_v17, 0.0  ;;  %v418_v22 = vmax.f32 %v404_v20, 0.0 }
 0x154   : > { %v430_v16 = vmul.f32 %v1045_v60, %v415_v11  ;;  %v434_v18 = vmul.f32 %v1045_v60, %v419_v15 }
 0x155   : > { %v429_v23 = vmul.f32 %v1045_v60, %v414_v19  ;;  %v433_v25 = vmul.f32 %v1045_v60, %v418_v22 }
 0x156   : > { %445 = vadd.xlane.f32.xlu1 %v432_v7  ;;  %v481_v39 = vpop.permute.xlu1 %480  ;;  %v502_v46 = vpop.permute.xlu0 %501 }
 0x15a   : > { %443 = vadd.xlane.f32.xlu1 %v431_v14  ;;  %v488_v42 = vpop.permute.xlu1 %487 }
 0x15e   : > { %441 = vadd.xlane.f32.xlu1 %v430_v16  ;;  %v495_v45 = vpop.permute.xlu1 %494 }
 0x162   : > { %449 = vadd.xlane.f32.xlu1 %v434_v18 }
 0x166   : > { %439 = vadd.xlane.f32.xlu1 %v429_v23 }
 0x169   : > { %515 = vbcast.lane.b32.xlu0 %v513_v24, 256 }
 0x16a   : > { %447 = vadd.xlane.f32.xlu1 %v433_v25 }
 0x17b   : > { %508 = vbcast.lane.b32.xlu1 %v506_v27, 256 }
 0x1df   : > { %v438_v48 = vpop.xlane.xlu1 %437 }
 0x1e0   : > { %v1669_v49 = vadd.f32 %v474_v44, %v438_v48  ;;  %v436_v51 = vpop.xlane.xlu0 %435 }
 0x1e1   : > { %v525_v52 = vadd.f32 %v467_v34, %v436_v51 }
 0x1e2   : > { %545 = vperm.xlu0 %1229, %v1669_v49  }
 0x1e3   : > { %v446_v53 = vpop.xlane.xlu1 %445  ;;  %542 = vperm.xlu1 %1230, %v525_v52  }
 0x1e4   : > { %v1672_v54 = vadd.f32 %v502_v46, %v446_v53  ;;  %v516_v58 = vpop.permute.xlu0 %515 }
 0x1e6   : > { %557 = vperm.xlu0 %1229, %v1672_v54  }
 0x1e7   : > { %v444_v43 = vpop.xlane.xlu1 %443 }
 0x1e8   : > { %v1675_v55 = vadd.f32 %v495_v45, %v444_v43 }
 0x1ea   : > { %554 = vperm.xlu1 %1230, %v1675_v55  }
 0x1eb   : > { %v442_v56 = vpop.xlane.xlu1 %441 }
 0x1ec   : > { %v528_v57 = vadd.f32 %v488_v42, %v442_v56 }
 0x1ee   : > { %551 = vperm.xlu0 %1229, %v528_v57  }
 0x1ef   : > { %v450_v59 = vpop.xlane.xlu1 %449 }
 0x1f0   : > { %v1678_v60 = vadd.f32 %v516_v58, %v450_v59 }
 0x1f2   : > { %563 = vperm.xlu0 %1229, %v1678_v60  }
 0x1f3   : > { %v440_v61 = vpop.xlane.xlu1 %439 }
 0x1f4   : > { %v527_v62 = vadd.f32 %v481_v39, %v440_v61 }
 0x1f6   : > { %548 = vperm.xlu1 %1230, %v527_v62  }
 0x1f7   : > { %v448_v63 = vpop.xlane.xlu1 %447 }
 0x1fb   : > { %v509_v0 = vpop.permute.xlu1 %508 }
 0x1fc   : > { %v1681_v1 = vadd.f32 %v509_v0, %v448_v63 }
 0x1fe   : > { %560 = vperm.xlu1 %1230, %v1681_v1  }
 0x261   : > { %v546_v2 = vpop.permute.xlu0 %545 }
 0x262   : > { %v543_v3 = vpop.permute.xlu1 %542  ;;  %v572_v7 = vrot.slane %v546_v2, %v1686_v4 }
 0x263   : > { %v568_v8 = vrot.slane %v543_v3, %v1686_v4 }
 0x265   : > { %v558_v5 = vpop.permute.xlu0 %557  ;;  %v598_v14 = vsel %vm597_vm1, %v572_v7, %v568_v8 }
 0x266   : > { %v588_v19 = vrot.slane %v558_v5, %v1686_v4 }
 0x269   : > { %v555_v6 = vpop.permute.xlu1 %554 }
 0x26a   : > { %v584_v16 = vrot.slane %v555_v6, %v1686_v4 }
 0x26d   : > { %v552_v9 = vpop.permute.xlu0 %551 }
 0x26e   : > { %v580_v15 = vrot.slane %v552_v9, %v1686_v4 }
 0x271   : > { %v564_v17 = vpop.permute.xlu0 %563 }
 0x272   : > { %v596_v23 = vrot.slane %v564_v17, %v1686_v4 }
 0x275   : > { %v549_v11 = vpop.permute.xlu1 %548 }
 0x276   : > { %v576_v12 = vrot.slane %v549_v11, %v1686_v4 }
 0x278   : > { %v600_v35 = vsel %vm599_vm2, %v576_v12, %v598_v14 }
 0x279   : > { %v602_v36 = vsel %vm601_vm3, %v580_v15, %v600_v35 }
 0x27a   : > { %v604_v18 = vsel %vm603_vm4, %v584_v16, %v602_v36 }
 0x27b   : > { %v606_v24 = vsel %vm605_vm5, %v588_v19, %v604_v18 }
 0x27d   : > { %v561_v20 = vpop.permute.xlu1 %560 }
 0x27e   : > { %v592_v22 = vrot.slane %v561_v20, %v1686_v4 }
 0x280   : > { %v608_v25 = vsel %vm607_vm6, %v592_v22, %v606_v24 }
 0x281   : > { %v610_v27 = vsel %vm609_vm7, %v596_v23, %v608_v25 }
 0x282   : > { %v613_v34 = vsel %vm612_vm8, %v610_v27, -inf }
 0x283   : > { %614 = vmax.xlane.f32.xlu1 %v613_v34 }
 0x310   : > { %v615_v39 = vpop.xlane.xlu1 %614 }
 0x311   : > { %v620_v42 = vrot.slane %v615_v39, %v1631_v37  ;;  %v624_v44 = vrot.slane %v615_v39, %v1634_v38  ;;  %v628_v45 = vrot.slane %v615_v39, %v1638_v40  ;;  %v632_v53 = vrot.slane %v615_v39, %v1647_v47 }
 0x312   : > { %v636_v58 = vrot.slane %v615_v39, %v1652_v50  ;;  %v640_v63 = vrot.slane %v615_v39, %v1641_v41 }
 0x313   : > { %v657_v46 = vsub.f32 %v525_v52, %v620_v42  ;;  %v658_v48 = vsub.f32 %v1669_v49, %v624_v44  ;;  %v659_v43 = vsub.f32 %v527_v62, %v628_v45  ;;  %v660_v59 = vsub.f32 %v528_v57, %v632_v53 }
 0x314   : > { %v661_v0 = vsub.f32 %v1675_v55, %v636_v58  ;;  %v644_v49 = vrot.slane %v615_v39, %v1666_v26  ;;  %v662_v62 = vsub.f32 %v1672_v54, %v640_v63  ;;  %v648_v57 = vrot.slane %v615_v39, %v1662_v21 }
 0x315   : > { %v665_v51 = vmul.f32 1.442695, %v657_v46  ;;  %v667_v56 = vmul.f32 1.442695, %v658_v48  ;;  %v669_v61 = vmul.f32 1.442695, %v659_v43 }
 0x316   : > { %v671_v2 = vmul.f32 1.442695, %v660_v59  ;;  %v673_v3 = vmul.f32 1.442695, %v661_v0  ;;  %v663_v55 = vsub.f32 %v1681_v1, %v644_v49  ;;  %v675_v6 = vmul.f32 1.442695, %v662_v62 }
 0x317   : > { %1231 = vpow2.f32 %v665_v51  ;;  %v664_v8 = vsub.f32 %v1678_v60, %v648_v57 }
 0x318   : > { %1233 = vpow2.f32 %v667_v56  ;;  %v677_v54 = vmul.f32 1.442695, %v663_v55 }
 0x319   : > { %1235 = vpow2.f32 %v669_v61  ;;  %v679_v11 = vmul.f32 1.442695, %v664_v8 }
 0x31a   : > { %1237 = vpow2.f32 %v671_v2 }
 0x31b   : > { %1239 = vpow2.f32 %v673_v3 }
 0x31c   : > { %1241 = vpow2.f32 %v675_v6 }
 0x31d   : > { %1243 = vpow2.f32 %v677_v54 }
 0x31e   : > { %1245 = vpow2.f32 %v679_v11 }
 0x321   : > { %v1712_v52 = vpop.eup %1231 }
 0x322   : > { %690 = vperm.xlu0 %1229, %v1712_v52   ;;  %v1717_v5 = vpop.eup %1233 }
 0x323   : > { %v1722_v7 = vpop.eup %1235 }
 0x324   : > { %v1726_v9 = vpop.eup %1237 }
 0x325   : > { %v1729_v12 = vpop.eup %1239 }
 0x326   : > { %693 = vperm.xlu0 %1229, %v1717_v5   ;;  %v1242_v1 = vpop.eup %1241 }
 0x327   : > { %v1732_v14 = vpop.eup %1243 }
 0x328   : > { %v1735_v60 = vpop.eup %1245 }
 0x32a   : > { %696 = vperm.xlu0 %1229, %v1722_v7  }
 0x32e   : > { %699 = vperm.xlu0 %1229, %v1726_v9  }
 0x332   : > { %702 = vperm.xlu0 %1229, %v1729_v12  }
 0x336   : > { %705 = vperm.xlu0 %1229, %v1242_v1  }
 0x33a   : > { %708 = vperm.xlu0 %1229, %v1732_v14  }
 0x33e   : > { %711 = vperm.xlu0 %1229, %v1735_v60  }
 0x3a1   : > { %v691_v15 = vpop.permute.xlu0 %690 }
 0x3a2   : > { %v716_v22 = vrot.slane %v691_v15, %v1686_v4 }
 0x3a5   : > { %v694_v35 = vpop.permute.xlu0 %693 }
 0x3a6   : > { %v720_v19 = vrot.slane %v694_v35, %v1686_v4 }
 0x3a8   : > { %v745_v27 = vsel %vm597_vm1, %v720_v19, %v716_v22 }
 0x3a9   : > { %v697_v36 = vpop.permute.xlu0 %696 }
 0x3aa   : > { %v724_v20 = vrot.slane %v697_v36, %v1686_v4 }
 0x3ac   : > { %v746_v39 = vsel %vm599_vm2, %v724_v20, %v745_v27 }
 0x3ad   : > { %v700_v16 = vpop.permute.xlu0 %699 }
 0x3ae   : > { %v728_v23 = vrot.slane %v700_v16, %v1686_v4 }
 0x3b0   : > { %v747_v44 = vsel %vm601_vm3, %v728_v23, %v746_v39 }
 0x3b1   : > { %v703_v17 = vpop.permute.xlu0 %702 }
 0x3b2   : > { %v732_v24 = vrot.slane %v703_v17, %v1686_v4 }
 0x3b4   : > { %v748_v45 = vsel %vm603_vm4, %v732_v24, %v747_v44 }
 0x3b5   : > { %v706_v18 = vpop.permute.xlu0 %705 }
 0x3b6   : > { %v736_v34 = vrot.slane %v706_v18, %v1686_v4 }
 0x3b8   : > { %v749_v48 = vsel %vm605_vm5, %v736_v34, %v748_v45 }
 0x3b9   : > { %v709_v25 = vpop.permute.xlu0 %708 }
 0x3ba   : > { %v740_v42 = vrot.slane %v709_v25, %v1686_v4 }
 0x3bc   : > { %v750_v53 = vsel %vm607_vm6, %v740_v42, %v749_v48 }
 0x3bd   : > { %v712_v46 = vpop.permute.xlu0 %711 }
 0x3be   : > { %v744_v51 = vrot.slane %v712_v46, %v1686_v4 }
 0x3c0   : > { %v751_v43 = vsel %vm609_vm7, %v744_v51, %v750_v53 }
 0x3c1   : > { %v753_v56 = vsel %vm612_vm8, %v751_v43, 0.0 }
 0x3c2   : > { %754 = vadd.xlane.f32.xlu0 %v753_v56 }
 0x44f   : > { %v755_v58 = vpop.xlane.xlu0 %754 }
 0x450   : > { %v780_v59 = vrot.slane %v755_v58, %v1641_v41  ;;  %v760_v61 = vrot.slane %v755_v58, %v1631_v37  ;;  %v764_v63 = vrot.slane %v755_v58, %v1634_v38  ;;  %v768_v0 = vrot.slane %v755_v58, %v1638_v40 }
 0x451   : > { %v772_v4 = vrot.slane %v755_v58, %v1647_v47  ;;  %v776_v3 = vrot.slane %v755_v58, %v1652_v50  ;;  %v784_v37 = vrot.slane %v755_v58, %v1666_v26  ;;  %v788_v47 = vrot.slane %v755_v58, %v1662_v21 }
 0x452   : > { %1247 = vrcp.f32 %v780_v59 }
 0x453   : > { %1249 = vrcp.f32 %v760_v61 }
 0x454   : > { %1251 = vrcp.f32 %v764_v63 }
 0x455   : > { %1253 = vrcp.f32 %v768_v0 }
 0x456   : > { %1255 = vrcp.f32 %v772_v4 }
 0x457   : > { %1257 = vrcp.f32 %v776_v3 }
 0x458   : > { %1259 = vrcp.f32 %v784_v37 }
 0x459   : > { %1261 = vrcp.f32 %v788_v47 }
 0x45c   : > { %v1248_v2 = vpop.eup %1247 }
 0x45d   : > { %v1250_v49 = vpop.eup %1249  ;;  %v808_v62 = vmul.f32 %v1248_v2, %v1242_v1 }
 0x45e   : > { %v798_v41 = vmul.f32 %v1250_v49, %v1712_v52  ;;  %v1252_v57 = vpop.eup %1251 }
 0x45f   : > { %840 = vperm.xlu0 %1229, %v808_v62   ;;  %v800_v38 = vmul.f32 %v1252_v57, %v1717_v5  ;;  %v1254_v40 = vpop.eup %1253 }
 0x460   : > { %815 = vperm.xlu1 %1230, %v798_v41   ;;  %v802_v55 = vmul.f32 %v1254_v40, %v1722_v7  ;;  %v1256_v6 = vpop.eup %1255 }
 0x461   : > { %v804_v50 = vmul.f32 %v1256_v6, %v1726_v9  ;;  %v1258_v52 = vpop.eup %1257 }
 0x462   : > { %v806_v8 = vmul.f32 %v1258_v52, %v1729_v12  ;;  %v1260_v54 = vpop.eup %1259 }
 0x463   : > { %v810_v26 = vmul.f32 %v1260_v54, %v1732_v14  ;;  %v1262_v5 = vpop.eup %1261 }
 0x464   : > { %820 = vperm.xlu1 %1230, %v800_v38   ;;  %v812_v11 = vmul.f32 %v1262_v5, %v1735_v60 }
 0x468   : > { %825 = vperm.xlu1 %1230, %v802_v55  }
 0x46c   : > { %830 = vperm.xlu1 %1230, %v804_v50  }
 0x470   : > { %835 = vperm.xlu1 %1230, %v806_v8  }
 0x474   : > { %845 = vperm.xlu1 %1230, %v810_v26  }
 0x478   : > { %850 = vperm.xlu1 %1230, %v812_v11  }
 0x4de   : > { %v841_v9 = vpop.permute.xlu0 %840 }
 0x4df   : > { %v816_v21 = vpop.permute.xlu1 %815  ;;  %v858_v17 = vmul.f32 %v841_v9, %v1606_v29 }
 0x4e0   : > { %v853_v7 = vmul.f32 %v816_v21, %v1592_v10 }
 0x4e1   : > { %v891_v23 = vrot.slane %v858_v17, 4 }
 0x4e2   : > { %v861_v36 = vrot.slane %v853_v7, 4 }
 0x4e3   : > { %v821_v1 = vpop.permute.xlu1 %820  ;;  %v892_v42 = vadd.f32 %v891_v23, %v858_v17 }
 0x4e4   : > { %v854_v15 = vmul.f32 %v821_v1, %v1603_v28  ;;  %v862_v19 = vadd.f32 %v861_v36, %v853_v7 }
 0x4e5   : > { %v893_v43 = vrot.slane %v892_v42, 2 }
 0x4e6   : > { %v867_v35 = vrot.slane %v854_v15, 4  ;;  %v863_v25 = vrot.slane %v862_v19, 2 }
 0x4e7   : > { %v826_v16 = vpop.permute.xlu1 %825  ;;  %v894_v62 = vadd.f32 %v893_v43, %v892_v42 }
 0x4e8   : > { %v855_v12 = vmul.f32 %v826_v16, %v1609_v30  ;;  %v868_v14 = vadd.f32 %v867_v35, %v854_v15  ;;  %v864_v45 = vadd.f32 %v863_v25, %v862_v19 }
 0x4e9   : > { %v895_v50 = vrot.slane %v894_v62, 1 }
 0x4ea   : > { %v873_v18 = vrot.slane %v855_v12, 4  ;;  %v869_v10 = vrot.slane %v868_v14, 2  ;;  %v865_v61 = vrot.slane %v864_v45, 1 }
 0x4eb   : > { %v831_v20 = vpop.permute.xlu1 %830  ;;  %v896_v7 = vadd.f32 %v895_v50, %v894_v62 }
 0x4ec   : > { %v874_v60 = vadd.f32 %v873_v18, %v855_v12  ;;  %v856_v22 = vmul.f32 %v831_v20, %v1618_v32  ;;  %v870_v30 = vadd.f32 %v869_v10, %v868_v14 }
 0x4ee   : > { %v879_v24 = vrot.slane %v856_v22, 4  ;;  %v875_v28 = vrot.slane %v874_v60, 2  ;;  %v871_v56 = vrot.slane %v870_v30, 1 }
 0x4ef   : > { %v836_v27 = vpop.permute.xlu1 %835 }
 0x4f0   : > { %v880_v34 = vadd.f32 %v879_v24, %v856_v22  ;;  %v857_v39 = vmul.f32 %v836_v27, %v1599_v13  ;;  %v876_v46 = vadd.f32 %v875_v28, %v874_v60  ;;  %v872_v3 = vadd.f32 %v871_v56, %v870_v30 }
 0x4f2   : > { %v881_v44 = vrot.slane %v880_v34, 2  ;;  %v885_v29 = vrot.slane %v857_v39, 4  ;;  %v877_v63 = vrot.slane %v876_v46, 1 }
 0x4f3   : > { %v846_v48 = vpop.permute.xlu1 %845 }
 0x4f4   : > { %v882_v51 = vadd.f32 %v881_v44, %v880_v34  ;;  %v886_v53 = vadd.f32 %v885_v29, %v857_v39  ;;  %v859_v32 = vmul.f32 %v846_v48, %v1612_v31  ;;  %v878_v38 = vadd.f32 %v877_v63, %v876_v46 }
 0x4f5   : > { %v866_v31 = vadd.f32 %v865_v61, %v864_v45 }
 0x4f6   : > { %v887_v58 = vrot.slane %v886_v53, 2  ;;  %v897_v59 = vrot.slane %v859_v32, 4  ;;  %v883_v13 = vrot.slane %v882_v51, 1 }
 0x4f7   : > { %v851_v0 = vpop.permute.xlu1 %850  ;;  %v917_v52 = vsel %vm597_vm1, %v872_v3, %v866_v31 }
 0x4f8   : > { %v888_v4 = vadd.f32 %v887_v58, %v886_v53  ;;  %v898_v2 = vadd.f32 %v897_v59, %v859_v32  ;;  %v860_v49 = vmul.f32 %v851_v0, %v1622_v33  ;;  %v884_v40 = vadd.f32 %v883_v13, %v882_v51 }
 0x4f9   : > { %v918_v33 = vsel %vm599_vm2, %v878_v38, %v917_v52 }
 0x4fa   : > { %v889_v41 = vrot.slane %v888_v4, 1  ;;  %v899_v57 = vrot.slane %v898_v2, 2  ;;  %v903_v37 = vrot.slane %v860_v49, 4  ;;  %v919_v26 = vsel %vm601_vm3, %v884_v40, %v918_v33 }
 0x4fc   : > { %v900_v47 = vadd.f32 %v899_v57, %v898_v2  ;;  %v904_v55 = vadd.f32 %v903_v37, %v860_v49  ;;  %v890_v6 = vadd.f32 %v889_v41, %v888_v4 }
 0x4fe   : > { %v901_v8 = vrot.slane %v900_v47, 1  ;;  %v905_v54 = vrot.slane %v904_v55, 2  ;;  %v920_v11 = vsel %vm603_vm4, %v890_v6, %v919_v26 }
 0x4ff   : > { %v921_v9 = vsel %vm605_vm5, %v896_v7, %v920_v11 }
 0x500   : > { %v906_v5 = vadd.f32 %v905_v54, %v904_v55  ;;  %v902_v21 = vadd.f32 %v901_v8, %v900_v47 }
 0x502   : > { %v907_v1 = vrot.slane %v906_v5, 1  ;;  %v922_v35 = vsel %vm607_vm6, %v902_v21, %v921_v9 }
 0x504   : > { %v908_v15 = vadd.f32 %v907_v1, %v906_v5 }
 0x506   : > { %v923_v36 = vsel %vm609_vm7, %v908_v15, %v922_v35 }
 0x507   : > { %925 = vst [vmem:[%s270_s10] sm:$0xff] %v923_v36 }
 0x508   : > { %1334 = shalt.err (!%p1331_p9)
}
 0x509   : > { %s1335_s23 = scalar_lea.hbm %s1788_s26, 128  ;;  %s1339_s15 = scalar_lea.hbm %s1838_s5, 256 }
 0x50a   : > { %p1336_p1 = scmp.ne.s32.totalorder %s1788_s26, %s1335_s23  ;;  %p1340_p11 = scmp.lt.u32.totalorder %s1788_s26, %s1838_s5 }
 0x50b   : > { %p1341_p2 = scmp.lt.u32.totalorder %s1339_s15, %s1335_s23  ;;  %p1343_p6 = scmp.lt.u32.totalorder %s1335_s23, %s1788_s26 }
 0x50c   : > { %p1337_p0 = pnand %p1336_p1, %p1524_p12 }
 0x50d   : > { %p1342_p4 = por %p1341_p2, %p1340_p11 }
 0x50e   : > { %p1338_p5 = pneg %p1337_p0 }
 0x50f   : > { %p1344_p8 = por %p1343_p6, %p1342_p4 }
 0x511   : > { %p1345_p10 = pnand %p1344_p8, %p1338_p5 }
 0x513   : > { %1348 = shalt.err (!%p1345_p10)
}
 0x514   : > { %1174 = dma.vmem_to_hbm [thread:$0]  (%p1524_p12), %s1790_s11, 128, %s1788_s26, %s927_s22  }
 0x515 PF: > { %s952_s27 = sand.u32 1, %s1379_s18   ;;  %p1853_p13 = scmp.ne.s32.totalorder %s1843_s25, 0 }
 0x516   : > { %p1854_p3 = scmp.ge.s32.totalorder %s1391_s21, 2  ;;  %s953_s10 = scalar_lea.sflag [#allocation4], %s952_s27 }
 0x518   : > { %p1185_p7 = pnand %p1854_p3, %p1853_p13 }
 0x51a   : > { %1374 = dma.done.wait (!%p1185_p7), %s953_s10, 128  }
 0x51b   : > { %1376 = vsyncadd (!%p1185_p7), %s953_s10, 4294967168  ;;  %p19_p9 = scmp.ge.s32.totalorder %s1486_s30, 4   ;;  %s1855_s18 = smov %s1383_s19 }
 0x51c   : > { %s1856_s19 = smov %s1387_s20  ;;  %s1857_s20 = smov %s1520_s8 }
 0x51d   : > { %s1858_s21 = smov %s1486_s30  ;;  %21 = sbr.rel (!%p19_p9) target bundleno = 6 (0x6), region = 92 }
 0x524   :  { %958 = vsyncpa [#allocation3], 1 }
 0x525   :  { %960 = vsyncpa [#allocation3 + $0x1], 1 }
 0x526   :  { %961 = vsyncpa [#allocation6], 1 }
 0x527   :  { %962 = vsyncpa [#allocation4], 1 }
 0x528   :  { %964 = vsyncpa [#allocation4 + $0x1], 1 }

</bundles_post_ra>
